<compile_context>
chip_gen: v6e
topology: v6e:2x2x1
jax: 0.10.0
libtpu: 0.0.40
codegen_flags: <defaults>
</compile_context>

<pallas_src>
import jax
import jax.numpy as jnp
from jax.experimental import pallas as pl
from jax.experimental.pallas import tpu as pltpu


def gru_kernel(gi_ref, whh_rz_ref, whh_n_ref, bhh_n_ref, out_ref):
    """Pure GRU recurrence.

    gi_ref:     (T, B, 3H) f32  precomputed input gates [r|z|n], with b_ih and
                the r/z parts of b_hh already folded in by the wrapper.
    whh_rz_ref: (H, 2H) f32     hidden -> r|z weights.
    whh_n_ref:  (H, H)  f32     hidden -> n weights.
    bhh_n_ref:  (1, H)  f32     hidden n bias (must stay inside r * (...)).
    out_ref:    (T, B, H) f32   all hidden states.
    """
    T, B, H = out_ref.shape

    gi = gi_ref[...]            # (T, B, 3H), resident for the whole loop
    w_rz = whh_rz_ref[...]      # (H, 2H)
    w_n = whh_n_ref[...]        # (H, H)
    b_n = bhh_n_ref[...]        # (1, H)

    h = jnp.zeros((B, H), jnp.float32)      # PyTorch default h0 = zeros
    hs = []
    # TODO(synk): for large T, replace the full unroll with lax.fori_loop or a
    # grid axis over T (unroll is fine at T=8 but blows up vregs/compile time).
    for t in range(T):
        gi_t = gi[t]                                               # (B, 3H) static slice
        # Two back-to-back MXU pushes; the r|z sigmoid below overlaps the
        # n-gate matmul still in the MXU pipeline.
        gh_rz = jnp.dot(h, w_rz, preferred_element_type=jnp.float32)   # (B, 2H)
        gh_n = jnp.dot(h, w_n, preferred_element_type=jnp.float32)     # (B, H)

        # Single EUP pass for both r and z (biases already folded into gi).
        rz = jax.nn.sigmoid(gi_t[:, :2 * H] + gh_rz)               # (B, 2H)
        r = rz[:, :H]       # NOTE: at large H keep H % 128 == 0 so these
        z = rz[:, H:]       # slices are vreg-aligned picks.
        n = jnp.tanh(gi_t[:, 2 * H:] + r * (gh_n + b_n))
        h = (1.0 - z) * n + z * h
        hs.append(h)

    # Single store of the whole output block (no per-step masked stores).
    out_ref[...] = jnp.stack(hs, axis=0).astype(out_ref.dtype)


def encoder_forward(tokens, params):
    """tokens: (T, B) int32.  Returns (output (T,B,H), hidden (1,B,H))."""
    T, B = tokens.shape
    H = params["embedding"].shape[1]

    b_ih = params["b_ih"]                  # (3H,)  [b_ir | b_iz | b_in]
    b_hh = params["b_hh"]                  # (3H,)  [b_hr | b_hz | b_hn]

    # Parameter-only glue (constant-folded under jit):
    #   EW[v] = embedding[v] @ w_ih.T + b_ih + [b_hr | b_hz | 0]
    # The r/z parts of b_hh sit outside the r*(...) term so they fold here;
    # b_hh_n must remain inside the kernel's n-gate.
    bias_fold = b_ih + jnp.concatenate(
        [b_hh[:2 * H], jnp.zeros((H,), b_hh.dtype)])
    ew = params["embedding"] @ params["w_ih"].T + bias_fold[None, :]    # (V, 3H)

    # Glue: one token gather replaces both the embedding lookup and the
    # hoisted input-projection matmul.
    gi = jnp.take(ew, tokens, axis=0)                                   # (T, B, 3H)

    w_hh_t = params["w_hh"].T                                           # (H, 3H) [r|z|n]
    whh_rz = w_hh_t[:, :2 * H]                                          # (H, 2H)
    whh_n = w_hh_t[:, 2 * H:]                                           # (H, H)
    bhh_n = b_hh[2 * H:].reshape(1, H)                                  # (1, H)

    vmem = pl.BlockSpec(memory_space=pltpu.MemorySpace.VMEM)
    out = pl.pallas_call(
        gru_kernel,
        out_shape=jax.ShapeDtypeStruct((T, B, H), jnp.float32),
        in_specs=[vmem, vmem, vmem, vmem],
        out_specs=vmem,
    )(gi, whh_rz, whh_n, bhh_n)

    # Single-layer unidirectional GRU: h_n == output at the last timestep.
    hidden = out[T - 1:T]                                               # (1, B, H)
    return out, hidden


def encoder_reference(tokens, params):
    """Pure-JAX reference reproducing torch.nn.GRU semantics."""
    x = jnp.take(params["embedding"], tokens, axis=0)
    w_ih, w_hh, b_ih, b_hh = (params["w_ih"], params["w_hh"],
                              params["b_ih"], params["b_hh"])
    B = tokens.shape[1]
    H = params["embedding"].shape[1]

    def step(h, x_t):
        gi = x_t @ w_ih.T + b_ih
        gh = h @ w_hh.T + b_hh
        i_r, i_z, i_n = jnp.split(gi, 3, axis=-1)
        h_r, h_z, h_n = jnp.split(gh, 3, axis=-1)
        r = jax.nn.sigmoid(i_r + h_r)
        z = jax.nn.sigmoid(i_z + h_z)
        n = jnp.tanh(i_n + r * h_n)
        h_new = (1.0 - z) * n + z * h
        return h_new, h_new

    h0 = jnp.zeros((B, H), jnp.float32)
    h_last, outs = jax.lax.scan(step, h0, x)
    return outs, h_last[None]


if __name__ == "__main__":
    vocab_size, hidden_size = 20, 32     # Encoder(input_size=20, hidden_size=32)
    T, B = 8, 4                          # seq_len=8, batch=4

    key = jax.random.PRNGKey(0)
    k_emb, k1, k2, k3, k4, k_tok = jax.random.split(key, 6)
    bound = 1.0 / (hidden_size ** 0.5)   # PyTorch GRU init range

    params = {
        # nn.Embedding(input_size, hidden_size): weight ~ N(0, 1)
        "embedding": jax.random.normal(k_emb, (vocab_size, hidden_size), jnp.float32),
        # nn.GRU(hidden_size, hidden_size): weight_ih_l0, weight_hh_l0, biases
        "w_ih": jax.random.uniform(k1, (3 * hidden_size, hidden_size),
                                   jnp.float32, -bound, bound),
        "w_hh": jax.random.uniform(k2, (3 * hidden_size, hidden_size),
                                   jnp.float32, -bound, bound),
        "b_ih": jax.random.uniform(k3, (3 * hidden_size,), jnp.float32, -bound, bound),
        "b_hh": jax.random.uniform(k4, (3 * hidden_size,), jnp.float32, -bound, bound),
    }
    tokens = jax.random.randint(k_tok, (T, B), 0, vocab_size, jnp.int32)

    out, hidden = jax.block_until_ready(encoder_forward(tokens, params))

    ref_out, ref_hidden = encoder_reference(tokens, params)
    assert out.shape == (T, B, hidden_size)
    assert hidden.shape == (1, B, hidden_size)
    assert jnp.allclose(out, ref_out, atol=2e-5, rtol=1e-5)
    assert jnp.allclose(hidden, ref_hidden, atol=2e-5, rtol=1e-5)

    print("KERNEL_OK")
</pallas_src>

<mosaic_0001>
module attributes {stable_mosaic.version = 11 : i64} {
  func.func @gru_kernel(%arg0: memref<8x4x96xf32, #tpu.memory_space<vmem>>, %arg1: memref<32x64xf32, #tpu.memory_space<vmem>>, %arg2: memref<32x32xf32, #tpu.memory_space<vmem>>, %arg3: memref<1x32xf32, #tpu.memory_space<vmem>>, %arg4: memref<8x4x32xf32, #tpu.memory_space<vmem>>) attributes {dimension_semantics = [], scalar_prefetch = 0 : i64, scratch_operands = 0 : i64, tpu.core_type = #tpu.core_type<tc>} {
    %c0 = arith.constant 0 : index
    %c0_0 = arith.constant 0 : index
    %c0_1 = arith.constant 0 : index
    %0 = vector.load %arg0[%c0, %c0_0, %c0_1] : memref<8x4x96xf32, #tpu.memory_space<vmem>>, vector<8x4x96xf32>
    %c0_2 = arith.constant 0 : index
    %c0_3 = arith.constant 0 : index
    %1 = vector.load %arg1[%c0_2, %c0_3] : memref<32x64xf32, #tpu.memory_space<vmem>>, vector<32x64xf32>
    %c0_4 = arith.constant 0 : index
    %c0_5 = arith.constant 0 : index
    %2 = vector.load %arg2[%c0_4, %c0_5] : memref<32x32xf32, #tpu.memory_space<vmem>>, vector<32x32xf32>
    %c0_6 = arith.constant 0 : index
    %c0_7 = arith.constant 0 : index
    %3 = vector.load %arg3[%c0_6, %c0_7] : memref<1x32xf32, #tpu.memory_space<vmem>>, vector<1x32xf32>
    %cst = arith.constant 0.000000e+00 : f32
    %4 = vector.broadcast %cst : f32 to vector<4x32xf32>
    %5 = vector.extract_strided_slice %0 {offsets = [0, 0, 0], sizes = [1, 4, 96], strides = [1, 1, 1]} : vector<8x4x96xf32> to vector<1x4x96xf32>
    %6 = vector.shape_cast %5 : vector<1x4x96xf32> to vector<4x96xf32>
    %cst_8 = arith.constant dense<0.000000e+00> : vector<4x64xf32>
    %7 = tpu.matmul %4, %1, %cst_8 {dimension_numbers = #tpu.dot_dimension_numbers<[1], [0], [0], [1], [0, 0, 1, 1], [], []>} : vector<4x32xf32>, vector<32x64xf32>, vector<4x64xf32> -> vector<4x64xf32>
    %cst_9 = arith.constant dense<0.000000e+00> : vector<4x32xf32>
    %8 = tpu.matmul %4, %2, %cst_9 {dimension_numbers = #tpu.dot_dimension_numbers<[1], [0], [0], [1], [0, 0, 1, 1], [], []>} : vector<4x32xf32>, vector<32x32xf32>, vector<4x32xf32> -> vector<4x32xf32>
    %9 = vector.extract_strided_slice %6 {offsets = [0, 0], sizes = [4, 64], strides = [1, 1]} : vector<4x96xf32> to vector<4x64xf32>
    %10 = arith.addf %9, %7 : vector<4x64xf32>
    %11 = arith.negf %10 : vector<4x64xf32>
    %12 = math.exp %11 : vector<4x64xf32>
    %cst_10 = arith.constant 1.000000e+00 : f32
    %13 = vector.broadcast %cst_10 : f32 to vector<4x64xf32>
    %14 = arith.addf %13, %12 : vector<4x64xf32>
    %15 = arith.divf %13, %14 : vector<4x64xf32>
    %16 = vector.extract_strided_slice %15 {offsets = [0, 0], sizes = [4, 32], strides = [1, 1]} : vector<4x64xf32> to vector<4x32xf32>
    %17 = vector.extract_strided_slice %15 {offsets = [0, 32], sizes = [4, 32], strides = [1, 1]} : vector<4x64xf32> to vector<4x32xf32>
    %18 = vector.extract_strided_slice %6 {offsets = [0, 64], sizes = [4, 32], strides = [1, 1]} : vector<4x96xf32> to vector<4x32xf32>
    %19 = vector.broadcast %3 : vector<1x32xf32> to vector<4x32xf32>
    %20 = arith.addf %8, %19 : vector<4x32xf32>
    %21 = arith.mulf %16, %20 : vector<4x32xf32>
    %22 = arith.addf %18, %21 : vector<4x32xf32>
    %23 = math.tanh %22 : vector<4x32xf32>
    %cst_11 = arith.constant 1.000000e+00 : f32
    %24 = vector.broadcast %cst_11 : f32 to vector<4x32xf32>
    %25 = arith.subf %24, %17 : vector<4x32xf32>
    %26 = arith.mulf %25, %23 : vector<4x32xf32>
    %27 = arith.mulf %17, %4 : vector<4x32xf32>
    %28 = arith.addf %26, %27 : vector<4x32xf32>
    %29 = vector.extract_strided_slice %0 {offsets = [1, 0, 0], sizes = [1, 4, 96], strides = [1, 1, 1]} : vector<8x4x96xf32> to vector<1x4x96xf32>
    %30 = vector.shape_cast %29 : vector<1x4x96xf32> to vector<4x96xf32>
    %cst_12 = arith.constant dense<0.000000e+00> : vector<4x64xf32>
    %31 = tpu.matmul %28, %1, %cst_12 {dimension_numbers = #tpu.dot_dimension_numbers<[1], [0], [0], [1], [0, 0, 1, 1], [], []>} : vector<4x32xf32>, vector<32x64xf32>, vector<4x64xf32> -> vector<4x64xf32>
    %cst_13 = arith.constant dense<0.000000e+00> : vector<4x32xf32>
    %32 = tpu.matmul %28, %2, %cst_13 {dimension_numbers = #tpu.dot_dimension_numbers<[1], [0], [0], [1], [0, 0, 1, 1], [], []>} : vector<4x32xf32>, vector<32x32xf32>, vector<4x32xf32> -> vector<4x32xf32>
    %33 = vector.extract_strided_slice %30 {offsets = [0, 0], sizes = [4, 64], strides = [1, 1]} : vector<4x96xf32> to vector<4x64xf32>
    %34 = arith.addf %33, %31 : vector<4x64xf32>
    %35 = arith.negf %34 : vector<4x64xf32>
    %36 = math.exp %35 : vector<4x64xf32>
    %cst_14 = arith.constant 1.000000e+00 : f32
    %37 = vector.broadcast %cst_14 : f32 to vector<4x64xf32>
    %38 = arith.addf %37, %36 : vector<4x64xf32>
    %39 = arith.divf %37, %38 : vector<4x64xf32>
    %40 = vector.extract_strided_slice %39 {offsets = [0, 0], sizes = [4, 32], strides = [1, 1]} : vector<4x64xf32> to vector<4x32xf32>
    %41 = vector.extract_strided_slice %39 {offsets = [0, 32], sizes = [4, 32], strides = [1, 1]} : vector<4x64xf32> to vector<4x32xf32>
    %42 = vector.extract_strided_slice %30 {offsets = [0, 64], sizes = [4, 32], strides = [1, 1]} : vector<4x96xf32> to vector<4x32xf32>
    %43 = vector.broadcast %3 : vector<1x32xf32> to vector<4x32xf32>
    %44 = arith.addf %32, %43 : vector<4x32xf32>
    %45 = arith.mulf %40, %44 : vector<4x32xf32>
    %46 = arith.addf %42, %45 : vector<4x32xf32>
    %47 = math.tanh %46 : vector<4x32xf32>
    %cst_15 = arith.constant 1.000000e+00 : f32
    %48 = vector.broadcast %cst_15 : f32 to vector<4x32xf32>
    %49 = arith.subf %48, %41 : vector<4x32xf32>
    %50 = arith.mulf %49, %47 : vector<4x32xf32>
    %51 = arith.mulf %41, %28 : vector<4x32xf32>
    %52 = arith.addf %50, %51 : vector<4x32xf32>
    %53 = vector.extract_strided_slice %0 {offsets = [2, 0, 0], sizes = [1, 4, 96], strides = [1, 1, 1]} : vector<8x4x96xf32> to vector<1x4x96xf32>
    %54 = vector.shape_cast %53 : vector<1x4x96xf32> to vector<4x96xf32>
    %cst_16 = arith.constant dense<0.000000e+00> : vector<4x64xf32>
    %55 = tpu.matmul %52, %1, %cst_16 {dimension_numbers = #tpu.dot_dimension_numbers<[1], [0], [0], [1], [0, 0, 1, 1], [], []>} : vector<4x32xf32>, vector<32x64xf32>, vector<4x64xf32> -> vector<4x64xf32>
    %cst_17 = arith.constant dense<0.000000e+00> : vector<4x32xf32>
    %56 = tpu.matmul %52, %2, %cst_17 {dimension_numbers = #tpu.dot_dimension_numbers<[1], [0], [0], [1], [0, 0, 1, 1], [], []>} : vector<4x32xf32>, vector<32x32xf32>, vector<4x32xf32> -> vector<4x32xf32>
    %57 = vector.extract_strided_slice %54 {offsets = [0, 0], sizes = [4, 64], strides = [1, 1]} : vector<4x96xf32> to vector<4x64xf32>
    %58 = arith.addf %57, %55 : vector<4x64xf32>
    %59 = arith.negf %58 : vector<4x64xf32>
    %60 = math.exp %59 : vector<4x64xf32>
    %cst_18 = arith.constant 1.000000e+00 : f32
    %61 = vector.broadcast %cst_18 : f32 to vector<4x64xf32>
    %62 = arith.addf %61, %60 : vector<4x64xf32>
    %63 = arith.divf %61, %62 : vector<4x64xf32>
    %64 = vector.extract_strided_slice %63 {offsets = [0, 0], sizes = [4, 32], strides = [1, 1]} : vector<4x64xf32> to vector<4x32xf32>
    %65 = vector.extract_strided_slice %63 {offsets = [0, 32], sizes = [4, 32], strides = [1, 1]} : vector<4x64xf32> to vector<4x32xf32>
    %66 = vector.extract_strided_slice %54 {offsets = [0, 64], sizes = [4, 32], strides = [1, 1]} : vector<4x96xf32> to vector<4x32xf32>
    %67 = vector.broadcast %3 : vector<1x32xf32> to vector<4x32xf32>
    %68 = arith.addf %56, %67 : vector<4x32xf32>
    %69 = arith.mulf %64, %68 : vector<4x32xf32>
    %70 = arith.addf %66, %69 : vector<4x32xf32>
    %71 = math.tanh %70 : vector<4x32xf32>
    %cst_19 = arith.constant 1.000000e+00 : f32
    %72 = vector.broadcast %cst_19 : f32 to vector<4x32xf32>
    %73 = arith.subf %72, %65 : vector<4x32xf32>
    %74 = arith.mulf %73, %71 : vector<4x32xf32>
    %75 = arith.mulf %65, %52 : vector<4x32xf32>
    %76 = arith.addf %74, %75 : vector<4x32xf32>
    %77 = vector.extract_strided_slice %0 {offsets = [3, 0, 0], sizes = [1, 4, 96], strides = [1, 1, 1]} : vector<8x4x96xf32> to vector<1x4x96xf32>
    %78 = vector.shape_cast %77 : vector<1x4x96xf32> to vector<4x96xf32>
    %cst_20 = arith.constant dense<0.000000e+00> : vector<4x64xf32>
    %79 = tpu.matmul %76, %1, %cst_20 {dimension_numbers = #tpu.dot_dimension_numbers<[1], [0], [0], [1], [0, 0, 1, 1], [], []>} : vector<4x32xf32>, vector<32x64xf32>, vector<4x64xf32> -> vector<4x64xf32>
    %cst_21 = arith.constant dense<0.000000e+00> : vector<4x32xf32>
    %80 = tpu.matmul %76, %2, %cst_21 {dimension_numbers = #tpu.dot_dimension_numbers<[1], [0], [0], [1], [0, 0, 1, 1], [], []>} : vector<4x32xf32>, vector<32x32xf32>, vector<4x32xf32> -> vector<4x32xf32>
    %81 = vector.extract_strided_slice %78 {offsets = [0, 0], sizes = [4, 64], strides = [1, 1]} : vector<4x96xf32> to vector<4x64xf32>
    %82 = arith.addf %81, %79 : vector<4x64xf32>
    %83 = arith.negf %82 : vector<4x64xf32>
    %84 = math.exp %83 : vector<4x64xf32>
    %cst_22 = arith.constant 1.000000e+00 : f32
    %85 = vector.broadcast %cst_22 : f32 to vector<4x64xf32>
    %86 = arith.addf %85, %84 : vector<4x64xf32>
    %87 = arith.divf %85, %86 : vector<4x64xf32>
    %88 = vector.extract_strided_slice %87 {offsets = [0, 0], sizes = [4, 32], strides = [1, 1]} : vector<4x64xf32> to vector<4x32xf32>
    %89 = vector.extract_strided_slice %87 {offsets = [0, 32], sizes = [4, 32], strides = [1, 1]} : vector<4x64xf32> to vector<4x32xf32>
    %90 = vector.extract_strided_slice %78 {offsets = [0, 64], sizes = [4, 32], strides = [1, 1]} : vector<4x96xf32> to vector<4x32xf32>
    %91 = vector.broadcast %3 : vector<1x32xf32> to vector<4x32xf32>
    %92 = arith.addf %80, %91 : vector<4x32xf32>
    %93 = arith.mulf %88, %92 : vector<4x32xf32>
    %94 = arith.addf %90, %93 : vector<4x32xf32>
    %95 = math.tanh %94 : vector<4x32xf32>
    %cst_23 = arith.constant 1.000000e+00 : f32
    %96 = vector.broadcast %cst_23 : f32 to vector<4x32xf32>
    %97 = arith.subf %96, %89 : vector<4x32xf32>
    %98 = arith.mulf %97, %95 : vector<4x32xf32>
    %99 = arith.mulf %89, %76 : vector<4x32xf32>
    %100 = arith.addf %98, %99 : vector<4x32xf32>
    %101 = vector.extract_strided_slice %0 {offsets = [4, 0, 0], sizes = [1, 4, 96], strides = [1, 1, 1]} : vector<8x4x96xf32> to vector<1x4x96xf32>
    %102 = vector.shape_cast %101 : vector<1x4x96xf32> to vector<4x96xf32>
    %cst_24 = arith.constant dense<0.000000e+00> : vector<4x64xf32>
    %103 = tpu.matmul %100, %1, %cst_24 {dimension_numbers = #tpu.dot_dimension_numbers<[1], [0], [0], [1], [0, 0, 1, 1], [], []>} : vector<4x32xf32>, vector<32x64xf32>, vector<4x64xf32> -> vector<4x64xf32>
    %cst_25 = arith.constant dense<0.000000e+00> : vector<4x32xf32>
    %104 = tpu.matmul %100, %2, %cst_25 {dimension_numbers = #tpu.dot_dimension_numbers<[1], [0], [0], [1], [0, 0, 1, 1], [], []>} : vector<4x32xf32>, vector<32x32xf32>, vector<4x32xf32> -> vector<4x32xf32>
    %105 = vector.extract_strided_slice %102 {offsets = [0, 0], sizes = [4, 64], strides = [1, 1]} : vector<4x96xf32> to vector<4x64xf32>
    %106 = arith.addf %105, %103 : vector<4x64xf32>
    %107 = arith.negf %106 : vector<4x64xf32>
    %108 = math.exp %107 : vector<4x64xf32>
    %cst_26 = arith.constant 1.000000e+00 : f32
    %109 = vector.broadcast %cst_26 : f32 to vector<4x64xf32>
    %110 = arith.addf %109, %108 : vector<4x64xf32>
    %111 = arith.divf %109, %110 : vector<4x64xf32>
    %112 = vector.extract_strided_slice %111 {offsets = [0, 0], sizes = [4, 32], strides = [1, 1]} : vector<4x64xf32> to vector<4x32xf32>
    %113 = vector.extract_strided_slice %111 {offsets = [0, 32], sizes = [4, 32], strides = [1, 1]} : vector<4x64xf32> to vector<4x32xf32>
    %114 = vector.extract_strided_slice %102 {offsets = [0, 64], sizes = [4, 32], strides = [1, 1]} : vector<4x96xf32> to vector<4x32xf32>
    %115 = vector.broadcast %3 : vector<1x32xf32> to vector<4x32xf32>
    %116 = arith.addf %104, %115 : vector<4x32xf32>
    %117 = arith.mulf %112, %116 : vector<4x32xf32>
    %118 = arith.addf %114, %117 : vector<4x32xf32>
    %119 = math.tanh %118 : vector<4x32xf32>
    %cst_27 = arith.constant 1.000000e+00 : f32
    %120 = vector.broadcast %cst_27 : f32 to vector<4x32xf32>
    %121 = arith.subf %120, %113 : vector<4x32xf32>
    %122 = arith.mulf %121, %119 : vector<4x32xf32>
    %123 = arith.mulf %113, %100 : vector<4x32xf32>
    %124 = arith.addf %122, %123 : vector<4x32xf32>
    %125 = vector.extract_strided_slice %0 {offsets = [5, 0, 0], sizes = [1, 4, 96], strides = [1, 1, 1]} : vector<8x4x96xf32> to vector<1x4x96xf32>
    %126 = vector.shape_cast %125 : vector<1x4x96xf32> to vector<4x96xf32>
    %cst_28 = arith.constant dense<0.000000e+00> : vector<4x64xf32>
    %127 = tpu.matmul %124, %1, %cst_28 {dimension_numbers = #tpu.dot_dimension_numbers<[1], [0], [0], [1], [0, 0, 1, 1], [], []>} : vector<4x32xf32>, vector<32x64xf32>, vector<4x64xf32> -> vector<4x64xf32>
    %cst_29 = arith.constant dense<0.000000e+00> : vector<4x32xf32>
    %128 = tpu.matmul %124, %2, %cst_29 {dimension_numbers = #tpu.dot_dimension_numbers<[1], [0], [0], [1], [0, 0, 1, 1], [], []>} : vector<4x32xf32>, vector<32x32xf32>, vector<4x32xf32> -> vector<4x32xf32>
    %129 = vector.extract_strided_slice %126 {offsets = [0, 0], sizes = [4, 64], strides = [1, 1]} : vector<4x96xf32> to vector<4x64xf32>
    %130 = arith.addf %129, %127 : vector<4x64xf32>
    %131 = arith.negf %130 : vector<4x64xf32>
    %132 = math.exp %131 : vector<4x64xf32>
    %cst_30 = arith.constant 1.000000e+00 : f32
    %133 = vector.broadcast %cst_30 : f32 to vector<4x64xf32>
    %134 = arith.addf %133, %132 : vector<4x64xf32>
    %135 = arith.divf %133, %134 : vector<4x64xf32>
    %136 = vector.extract_strided_slice %135 {offsets = [0, 0], sizes = [4, 32], strides = [1, 1]} : vector<4x64xf32> to vector<4x32xf32>
    %137 = vector.extract_strided_slice %135 {offsets = [0, 32], sizes = [4, 32], strides = [1, 1]} : vector<4x64xf32> to vector<4x32xf32>
    %138 = vector.extract_strided_slice %126 {offsets = [0, 64], sizes = [4, 32], strides = [1, 1]} : vector<4x96xf32> to vector<4x32xf32>
    %139 = vector.broadcast %3 : vector<1x32xf32> to vector<4x32xf32>
    %140 = arith.addf %128, %139 : vector<4x32xf32>
    %141 = arith.mulf %136, %140 : vector<4x32xf32>
    %142 = arith.addf %138, %141 : vector<4x32xf32>
    %143 = math.tanh %142 : vector<4x32xf32>
    %cst_31 = arith.constant 1.000000e+00 : f32
    %144 = vector.broadcast %cst_31 : f32 to vector<4x32xf32>
    %145 = arith.subf %144, %137 : vector<4x32xf32>
    %146 = arith.mulf %145, %143 : vector<4x32xf32>
    %147 = arith.mulf %137, %124 : vector<4x32xf32>
    %148 = arith.addf %146, %147 : vector<4x32xf32>
    %149 = vector.extract_strided_slice %0 {offsets = [6, 0, 0], sizes = [1, 4, 96], strides = [1, 1, 1]} : vector<8x4x96xf32> to vector<1x4x96xf32>
    %150 = vector.shape_cast %149 : vector<1x4x96xf32> to vector<4x96xf32>
    %cst_32 = arith.constant dense<0.000000e+00> : vector<4x64xf32>
    %151 = tpu.matmul %148, %1, %cst_32 {dimension_numbers = #tpu.dot_dimension_numbers<[1], [0], [0], [1], [0, 0, 1, 1], [], []>} : vector<4x32xf32>, vector<32x64xf32>, vector<4x64xf32> -> vector<4x64xf32>
    %cst_33 = arith.constant dense<0.000000e+00> : vector<4x32xf32>
    %152 = tpu.matmul %148, %2, %cst_33 {dimension_numbers = #tpu.dot_dimension_numbers<[1], [0], [0], [1], [0, 0, 1, 1], [], []>} : vector<4x32xf32>, vector<32x32xf32>, vector<4x32xf32> -> vector<4x32xf32>
    %153 = vector.extract_strided_slice %150 {offsets = [0, 0], sizes = [4, 64], strides = [1, 1]} : vector<4x96xf32> to vector<4x64xf32>
    %154 = arith.addf %153, %151 : vector<4x64xf32>
    %155 = arith.negf %154 : vector<4x64xf32>
    %156 = math.exp %155 : vector<4x64xf32>
    %cst_34 = arith.constant 1.000000e+00 : f32
    %157 = vector.broadcast %cst_34 : f32 to vector<4x64xf32>
    %158 = arith.addf %157, %156 : vector<4x64xf32>
    %159 = arith.divf %157, %158 : vector<4x64xf32>
    %160 = vector.extract_strided_slice %159 {offsets = [0, 0], sizes = [4, 32], strides = [1, 1]} : vector<4x64xf32> to vector<4x32xf32>
    %161 = vector.extract_strided_slice %159 {offsets = [0, 32], sizes = [4, 32], strides = [1, 1]} : vector<4x64xf32> to vector<4x32xf32>
    %162 = vector.extract_strided_slice %150 {offsets = [0, 64], sizes = [4, 32], strides = [1, 1]} : vector<4x96xf32> to vector<4x32xf32>
    %163 = vector.broadcast %3 : vector<1x32xf32> to vector<4x32xf32>
    %164 = arith.addf %152, %163 : vector<4x32xf32>
    %165 = arith.mulf %160, %164 : vector<4x32xf32>
    %166 = arith.addf %162, %165 : vector<4x32xf32>
    %167 = math.tanh %166 : vector<4x32xf32>
    %cst_35 = arith.constant 1.000000e+00 : f32
    %168 = vector.broadcast %cst_35 : f32 to vector<4x32xf32>
    %169 = arith.subf %168, %161 : vector<4x32xf32>
    %170 = arith.mulf %169, %167 : vector<4x32xf32>
    %171 = arith.mulf %161, %148 : vector<4x32xf32>
    %172 = arith.addf %170, %171 : vector<4x32xf32>
    %173 = vector.extract_strided_slice %0 {offsets = [7, 0, 0], sizes = [1, 4, 96], strides = [1, 1, 1]} : vector<8x4x96xf32> to vector<1x4x96xf32>
    %174 = vector.shape_cast %173 : vector<1x4x96xf32> to vector<4x96xf32>
    %cst_36 = arith.constant dense<0.000000e+00> : vector<4x64xf32>
    %175 = tpu.matmul %172, %1, %cst_36 {dimension_numbers = #tpu.dot_dimension_numbers<[1], [0], [0], [1], [0, 0, 1, 1], [], []>} : vector<4x32xf32>, vector<32x64xf32>, vector<4x64xf32> -> vector<4x64xf32>
    %cst_37 = arith.constant dense<0.000000e+00> : vector<4x32xf32>
    %176 = tpu.matmul %172, %2, %cst_37 {dimension_numbers = #tpu.dot_dimension_numbers<[1], [0], [0], [1], [0, 0, 1, 1], [], []>} : vector<4x32xf32>, vector<32x32xf32>, vector<4x32xf32> -> vector<4x32xf32>
    %177 = vector.extract_strided_slice %174 {offsets = [0, 0], sizes = [4, 64], strides = [1, 1]} : vector<4x96xf32> to vector<4x64xf32>
    %178 = arith.addf %177, %175 : vector<4x64xf32>
    %179 = arith.negf %178 : vector<4x64xf32>
    %180 = math.exp %179 : vector<4x64xf32>
    %cst_38 = arith.constant 1.000000e+00 : f32
    %181 = vector.broadcast %cst_38 : f32 to vector<4x64xf32>
    %182 = arith.addf %181, %180 : vector<4x64xf32>
    %183 = arith.divf %181, %182 : vector<4x64xf32>
    %184 = vector.extract_strided_slice %183 {offsets = [0, 0], sizes = [4, 32], strides = [1, 1]} : vector<4x64xf32> to vector<4x32xf32>
    %185 = vector.extract_strided_slice %183 {offsets = [0, 32], sizes = [4, 32], strides = [1, 1]} : vector<4x64xf32> to vector<4x32xf32>
    %186 = vector.extract_strided_slice %174 {offsets = [0, 64], sizes = [4, 32], strides = [1, 1]} : vector<4x96xf32> to vector<4x32xf32>
    %187 = vector.broadcast %3 : vector<1x32xf32> to vector<4x32xf32>
    %188 = arith.addf %176, %187 : vector<4x32xf32>
    %189 = arith.mulf %184, %188 : vector<4x32xf32>
    %190 = arith.addf %186, %189 : vector<4x32xf32>
    %191 = math.tanh %190 : vector<4x32xf32>
    %cst_39 = arith.constant 1.000000e+00 : f32
    %192 = vector.broadcast %cst_39 : f32 to vector<4x32xf32>
    %193 = arith.subf %192, %185 : vector<4x32xf32>
    %194 = arith.mulf %193, %191 : vector<4x32xf32>
    %195 = arith.mulf %185, %172 : vector<4x32xf32>
    %196 = arith.addf %194, %195 : vector<4x32xf32>
    %197 = vector.shape_cast %28 : vector<4x32xf32> to vector<1x4x32xf32>
    %198 = vector.shape_cast %52 : vector<4x32xf32> to vector<1x4x32xf32>
    %199 = vector.shape_cast %76 : vector<4x32xf32> to vector<1x4x32xf32>
    %200 = vector.shape_cast %100 : vector<4x32xf32> to vector<1x4x32xf32>
    %201 = vector.shape_cast %124 : vector<4x32xf32> to vector<1x4x32xf32>
    %202 = vector.shape_cast %148 : vector<4x32xf32> to vector<1x4x32xf32>
    %203 = vector.shape_cast %172 : vector<4x32xf32> to vector<1x4x32xf32>
    %204 = vector.shape_cast %196 : vector<4x32xf32> to vector<1x4x32xf32>
    %205 = tpu.concatenate %197, %198, %199, %200, %201, %202, %203, %204 in 0 : vector<1x4x32xf32>, vector<1x4x32xf32>, vector<1x4x32xf32>, vector<1x4x32xf32>, vector<1x4x32xf32>, vector<1x4x32xf32>, vector<1x4x32xf32>, vector<1x4x32xf32> -> vector<8x4x32xf32>
    %c0_40 = arith.constant 0 : index
    %c0_41 = arith.constant 0 : index
    %c0_42 = arith.constant 0 : index
    %206 = vector.load %arg4[%c0_40, %c0_41, %c0_42] : memref<8x4x32xf32, #tpu.memory_space<vmem>>, vector<8x4x32xf32>
    tpu.vector_store %arg4[%c0_40, %c0_41, %c0_42], %205 {strides = array<i32>} : memref<8x4x32xf32, #tpu.memory_space<vmem>>, vector<8x4x32xf32>,
    return
  }
}

</mosaic_0001>

<bundles_post_ra>
// kernel: tpu_custom_call.1
= control target key start
LH: loop header
LB: loop body
LE: loop exit
PB: predicated region body
PF: predicated region fallthrough
CT: control target
= control target key end

     0   :  { %9 = vsyncpa [#allocation3], 0  ;;  %s2170_s0 = inlined_call_operand.hbm [shape: f32[8,4,96], index: 0, kind: input, shape index: {}]   ;;  %s2171_s1 = inlined_call_operand.hbm [shape: f32[32,64], index: 1, kind: input, shape index: {}]   ;;  %s2172_s2 = inlined_call_operand.hbm [shape: f32[32,32], index: 2, kind: input, shape index: {}]   ;;  %s2173_s3 = inlined_call_operand.vmem [shape: f32[1,32], index: 3, kind: input, shape index: {}]   ;;  %s2174_s4 = inlined_call_operand.hbm [shape: f32[8,4,32], index: 4, kind: output, shape index: {}]  }
   0x1   :  { %10 = vsyncpa [#allocation6], 0 }
   0x2   :  { %11 = vsyncpa [#allocation4], 0  ;;  %s1879_s15 = smov [#allocation5]  }
   0x3   :  { %s29_s16 = sshll.u32 %s1879_s15, 4  ;;  %s30_s16 = int_to_ptr.vmem [resolvable:$true] %s29_s16 }
   0x4   :  { %s1801_s17 = scalar_lea.vmem %s30_s16, 512  ;;  %p1806_p1 = scmp.lt.s32.totalorder %s30_s16, %s30_s16 }
   0x5   :  { %p1802_p0 = scmp.ne.s32.totalorder %s30_s16, %s1801_s17  ;;  %p1807_p2 = scmp.lt.s32.totalorder %s1801_s17, %s1801_s17 }
   0x7   :  { %p1808_p3 = por %p1807_p2, %p1806_p1 }
   0x9   :  { %p1809_p4 = pnand %p1808_p3, %p1802_p0 }
   0xb   :  { %1812 = shalt.err (!%p1809_p4)
}
   0xc   :  { %s1880_s18 = smov 128   ;;  %s1881_s19 = smov 8  }
   0xd   :  { %35 = dma.hbm_to_vmem [thread:$0]  %s2171_s1, 512, %s30_s16, [#allocation6], %s1880_s18, %s1880_s18, %s1881_s19  }
   0xe   :  { %s1882_s22 = smov [#allocation2]  }
   0xf   :  { %s17_s23 = sshll.u32 %s1882_s22, 4  ;;  %s18_s23 = int_to_ptr.vmem [resolvable:$true] %s17_s23 }
  0x10   :  { %s1821_s24 = scalar_lea.vmem %s18_s23, 512  ;;  %p1826_p6 = scmp.lt.s32.totalorder %s18_s23, %s18_s23 }
  0x11   :  { %p1822_p5 = scmp.ne.s32.totalorder %s18_s23, %s1821_s24  ;;  %p1827_p7 = scmp.lt.s32.totalorder %s1821_s24, %s1821_s24 }
  0x13   :  { %p1828_p8 = por %p1827_p7, %p1826_p6 }
  0x15   :  { %p1829_p9 = pnand %p1828_p8, %p1822_p5 }
  0x17   :  { %1832 = shalt.err (!%p1829_p9)
}
  0x18   :  { %s1883_s25 = smov 64   ;;  %s1884_s26 = smov 4  }
  0x19   :  { %23 = dma.hbm_to_vmem [thread:$0]  %s2170_s0, 512, %s18_s23, [#allocation3], %s1883_s25, %s1883_s25, %s1884_s26  }
  0x1a   :  { %s1885_s1 = smov [#allocation7]  }
  0x1b   :  { %s41_s29 = sshll.u32 %s1885_s1, 4  ;;  %s42_s29 = int_to_ptr.vmem [resolvable:$true] %s41_s29 }
  0x1c   :  { %s1841_s30 = scalar_lea.vmem %s42_s29, 512  ;;  %p1846_p11 = scmp.lt.s32.totalorder %s42_s29, %s42_s29 }
  0x1d   :  { %p1842_p10 = scmp.ne.s32.totalorder %s42_s29, %s1841_s30  ;;  %p1847_p12 = scmp.lt.s32.totalorder %s1841_s30, %s1841_s30 }
  0x1f   :  { %p1848_p13 = por %p1847_p12, %p1846_p11 }
  0x21   :  { %p1849_p0 = pnand %p1848_p13, %p1842_p10 }
  0x23   :  { %1852 = shalt.err (!%p1849_p0)
}
  0x24   :  { %47 = dma.hbm_to_vmem [thread:$0]  %s2172_s2, 512, %s42_s29, [#allocation6], %s1880_s18, %s1880_s18, %s1881_s19  }
  0x25   :  { %1873 = dma.done.wait [#allocation3], 512  }
  0x26   :  { %1874 = vsyncadd [#allocation3], 4294966784 }
  0x27   :  { %1875 = dma.done.wait [#allocation6], 1024  }
  0x28   :  { %1876 = vsyncadd [#allocation6], 4294966272  ;;  %v1886_v0 = vmov 0.0   ;;  %vm1887_vm0 = vmmov 0   ;;  %v1933_v1 = vld [vmem:[#allocation5 + $0x18] sm:$0xff]  ;;  %v1935_v2 = vld [vmem:[#allocation5 + $0x10] sm:$0xff] }
  0x29   :  { %1558 = vmatprep.subr.mxu0 %v1886_v0  ;;  %1566 = vmatprep.mubr.msk.f32.mxu0 %vm1887_vm0, %v1886_v0  ;;  %v1938_v3 = vld [vmem:[#allocation7 + $0x18] sm:$0xff]  ;;  %v1940_v4 = vld [vmem:[#allocation7 + $0x10] sm:$0xff]  ;;  %v1943_v5 = vld [vmem:[#allocation5 + $0x8] sm:$0xff]  ;;  %s1888_s7 = smov 96   ;;  %vm1428_vm1 = vcmask 257024   ;;  %vm76_vm2 = vcmask 261120  }
  0x2a   :  { %1569 = vmatprep.subr.mxu1 %v1886_v0  ;;  %1577 = vmatprep.mubr.msk.f32.mxu1 %vm1887_vm0, %v1886_v0  ;;  %v1948_v6 = vld [vmem:[#allocation7 + $0x8] sm:$0xff]  ;;  %v1951_v7 = vld [vmem:[#allocation5] sm:$0xff] }
  0x2b   :  { %1559 = vmatpush3.msra.mxu0 %v1933_v1  ;;  %1570 = vmatpush3.msra.mxu1 %v1938_v3  ;;  %v1956_v8 = vld [vmem:[#allocation7] sm:$0xff]  ;;  %v61_v52 = vld [vmem:[#allocation2 + $0x8] sm:$0xf] }
  0x2c   :  { %1560 = vmatprep.subr.mxu0 %v1886_v0  ;;  %1571 = vmatprep.subr.mxu1 %v1886_v0  ;;  %v59_v9 = vld [vmem:[#allocation2] sm:$0xf]  ;;  %v60_v31 = vld [vmem:[#allocation2 + $0x4] sm:$0xf] }
  0x2d   :  { %1561 = vmatpush3.msra.mxu0 %v1935_v2  ;;  %1572 = vmatpush3.msra.mxu1 %v1940_v4  ;;  %v1990_v18 = vld [vmem:[%s2173_s3] ss:$0 sm:$0xff]  ;;  %s1889_s3 = smov [#allocation8]  }
  0x2e   :  { %1562 = vmatprep.subr.mxu0 %v1886_v0  ;;  %1573 = vmatprep.subr.mxu1 %v1886_v0  ;;  %s1442_s8 = sshll.u32 %s1889_s3, 4  ;;  %s1443_s8 = int_to_ptr.vmem [resolvable:$true] %s1442_s8 }
  0x2f   :  { %1563 = vmatpush3.msra.mxu0 %v1943_v5  ;;  %1574 = vmatpush3.msra.mxu1 %v1948_v6  ;;  %s1853_s9 = scalar_lea.vmem %s1443_s8, 512  ;;  %p1858_p2 = scmp.lt.s32.totalorder %s1443_s8, %s1443_s8 }
  0x30   :  { %1564 = vmatprep.subr.mxu0 %v1886_v0  ;;  %1575 = vmatprep.subr.mxu1 %v1886_v0  ;;  %p1854_p1 = scmp.ne.s32.totalorder %s1443_s8, %s1853_s9  ;;  %p1859_p3 = scmp.lt.s32.totalorder %s1853_s9, %s1853_s9 }
  0x31   :  { %1565 = vmatpush3.msra.mxu0 %v1951_v7  ;;  %1576 = vmatpush3.msra.mxu1 %v1956_v8 }
  0x32   :  { %1567 = vmatmul.mubr.f32.vlgmr.msra.gmra.mxu0 %v1886_v0  ;;  %1578 = vmatmul.mubr.f32.vlgmr.msra.gmra.mxu1 %v1886_v0  ;;  %p1860_p4 = por %p1859_p3, %p1858_p2 }
  0x33   :  { %1580 = vmatprep.subr.mxu0 %v1886_v0  ;;  %1591 = vmatprep.subr.mxu1 %v1886_v0 }
  0x34   :  { %1581 = vmatpush3.msra.mxu0 %v1933_v1  ;;  %1592 = vmatpush3.msra.mxu1 %v1938_v3  ;;  %p1861_p5 = pnand %p1860_p4, %p1854_p1 }
  0x35   :  { %1582 = vmatprep.subr.mxu0 %v1886_v0  ;;  %1593 = vmatprep.subr.mxu1 %v1886_v0 }
  0x36   :  { %1583 = vmatpush3.msra.mxu0 %v1935_v2  ;;  %1594 = vmatpush3.msra.mxu1 %v1940_v4 }
  0x37   :  { %1584 = vmatprep.subr.mxu0 %v1886_v0  ;;  %1595 = vmatprep.subr.mxu1 %v1886_v0 }
  0x38   :  { %1585 = vmatpush3.msra.mxu0 %v1943_v5  ;;  %1596 = vmatpush3.msra.mxu1 %v1948_v6 }
  0x39   :  { %1586 = vmatprep.subr.mxu0 %v1886_v0  ;;  %1597 = vmatprep.subr.mxu1 %v1886_v0 }
  0x3a   :  { %1587 = vmatpush3.msra.mxu0 %v1951_v7  ;;  %1588 = vmatprep.mubr.msk.f32.mxu0 %vm1887_vm0, %v1886_v0 }
  0x3b   :  { %1598 = vmatpush3.msra.mxu1 %v1956_v8  ;;  %1599 = vmatprep.mubr.msk.f32.mxu1 %vm1887_vm0, %v1886_v0 }
  0x3c   :  { %1602 = vmatprep.subr.mxu0 %v1886_v0  ;;  %1613 = vmatprep.subr.mxu1 %v1886_v0 }
  0xf2   :  { %v146_v10 = vpop.f32.mrf.mxu0  ;;  %v229_v12 = vpop.f32.mrf.mxu1 }
  0xf3   :  { %v150_v11 = vadd.f32 %v146_v10, %v59_v9  ;;  %v230_v19 = vadd.f32 %v1990_v18, %v229_v12 }
  0xf4   :  { %v1568_v13 = vpop.f32.mrf.mxu0  ;;  %v1579_v15 = vpop.f32.mrf.mxu1 }
  0xf5   :  { %v1455_v14 = vmul.f32 -1.442695, %v150_v11 }
  0xf7   :  { %1745 = vpow2.f32 %v1455_v14 }
 0x104   :  { %v1746_v16 = vpop.eup %1745 }
 0x105   :  { %v154_v17 = vadd.f32 1.0, %v1746_v16 }
 0x107   :  { %1747 = vrcp.f32 %v154_v17 }
 0x114   :  { %v1748_v20 = vpop.eup %1747 }
 0x115   :  { %v233_v21 = vmul.f32 %v1748_v20, %v230_v19  ;;  %v240_v25 = vsub.f32 1.0, %v1748_v20  ;;  %v246_v28 = vmul.f32 0.0, %v1748_v20  ;;  %v62_v19 = vld [vmem:[#allocation2 + $0xc] sm:$0xf] }
 0x117   :  { %235 = vrot.lane.b32.xlu0 %v233_v21, %s1883_s25 }
 0x189   :  { %v236_v22 = vpop.permute.xlu0 %235 }
 0x18a   :  { %v238_v23 = vadd.f32 %v236_v22, %v59_v9 }
 0x18c   :  { %1749 = vtanh.f32 %v238_v23 }
 0x199   :  { %v1750_v24 = vpop.eup %1749 }
 0x19a   :  { %242 = vrot.lane.b32.xlu0 %v1750_v24, %s1888_s7 }
 0x20c   :  { %v243_v26 = vpop.permute.xlu0 %242 }
 0x20d   :  { %v245_v27 = vmul.f32 %v243_v26, %v240_v25 }
 0x20f   :  { %v247_v29 = vadd.f32 %v246_v28, %v245_v27 }
 0x211   :  { %249 = vrot.lane.b32.xlu1 %v247_v29, %s1888_s7 }
 0x283   :  { %v250_v30 = vpop.permute.xlu1 %249 }
 0x284   :  { %1429 = vst.msk [vmem:[#allocation8] sm:$0xf] %vm1428_vm1, %v250_v30  ;;  %1589 = vmatmul.mubr.msk.f32.vlgmr.msra.gmra.mxu0 %vm76_vm2, %v250_v30  ;;  %1600 = vmatmul.mubr.msk.f32.vlgmr.msra.gmra.mxu1 %vm76_vm2, %v250_v30 }
 0x285   :  { %1603 = vmatpush3.msra.mxu0 %v1933_v1  ;;  %1614 = vmatpush3.msra.mxu1 %v1938_v3 }
 0x286   :  { %1604 = vmatprep.subr.mxu0 %v1886_v0  ;;  %1615 = vmatprep.subr.mxu1 %v1886_v0 }
 0x287   :  { %1605 = vmatpush3.msra.mxu0 %v1935_v2  ;;  %1616 = vmatpush3.msra.mxu1 %v1940_v4 }
 0x288   :  { %1606 = vmatprep.subr.mxu0 %v1886_v0  ;;  %1617 = vmatprep.subr.mxu1 %v1886_v0 }
 0x289   :  { %1607 = vmatpush3.msra.mxu0 %v1943_v5  ;;  %1618 = vmatpush3.msra.mxu1 %v1948_v6 }
 0x28a   :  { %1608 = vmatprep.subr.mxu0 %v1886_v0  ;;  %1619 = vmatprep.subr.mxu1 %v1886_v0 }
 0x28b   :  { %1609 = vmatpush3.msra.mxu0 %v1951_v7  ;;  %1610 = vmatprep.mubr.msk.f32.mxu0 %vm1887_vm0, %v1886_v0 }
 0x28c   :  { %1620 = vmatpush3.msra.mxu1 %v1956_v8  ;;  %1621 = vmatprep.mubr.msk.f32.mxu1 %vm1887_vm0, %v1886_v0 }
 0x28d   :  { %1624 = vmatprep.subr.mxu0 %v1886_v0  ;;  %1635 = vmatprep.subr.mxu1 %v1886_v0 }
 0x344   :  { %v319_v32 = vpop.f32.mrf.mxu0  ;;  %v396_v33 = vpop.f32.mrf.mxu1 }
 0x345   :  { %v323_v34 = vadd.f32 %v319_v32, %v60_v31  ;;  %v397_v40 = vadd.f32 %v1990_v18, %v396_v33 }
 0x346   :  { %v1590_v35 = vpop.f32.mrf.mxu0  ;;  %v1601_v36 = vpop.f32.mrf.mxu1 }
 0x347   :  { %v1458_v37 = vmul.f32 -1.442695, %v323_v34 }
 0x349   :  { %1751 = vpow2.f32 %v1458_v37 }
 0x356   :  { %v1752_v38 = vpop.eup %1751 }
 0x357   :  { %v327_v39 = vadd.f32 1.0, %v1752_v38 }
 0x359   :  { %1753 = vrcp.f32 %v327_v39 }
 0x366   :  { %v1754_v41 = vpop.eup %1753 }
 0x367   :  { %v400_v42 = vmul.f32 %v1754_v41, %v397_v40  ;;  %v407_v46 = vsub.f32 1.0, %v1754_v41  ;;  %v413_v48 = vmul.f32 %v1754_v41, %v247_v29  ;;  %v63_v40 = vld [vmem:[#allocation2 + $0x10] sm:$0xf] }
 0x369   :  { %402 = vrot.lane.b32.xlu1 %v400_v42, %s1883_s25 }
 0x3db   :  { %v403_v43 = vpop.permute.xlu1 %402 }
 0x3dc   :  { %v405_v44 = vadd.f32 %v403_v43, %v60_v31 }
 0x3de   :  { %1755 = vtanh.f32 %v405_v44 }
 0x3eb   :  { %v1756_v45 = vpop.eup %1755 }
 0x3ec   :  { %409 = vrot.lane.b32.xlu0 %v1756_v45, %s1888_s7 }
 0x45e   :  { %v410_v47 = vpop.permute.xlu0 %409 }
 0x45f   :  { %v412_v49 = vmul.f32 %v410_v47, %v407_v46 }
 0x461   :  { %v414_v50 = vadd.f32 %v413_v48, %v412_v49 }
 0x463   :  { %416 = vrot.lane.b32.xlu1 %v414_v50, %s1888_s7 }
 0x4d5   :  { %v417_v51 = vpop.permute.xlu1 %416 }
 0x4d6   :  { %1430 = vst.msk [vmem:[#allocation8 + $0x4] sm:$0xf] %vm1428_vm1, %v417_v51  ;;  %1611 = vmatmul.mubr.msk.f32.vlgmr.msra.gmra.mxu0 %vm76_vm2, %v417_v51  ;;  %1622 = vmatmul.mubr.msk.f32.vlgmr.msra.gmra.mxu1 %vm76_vm2, %v417_v51 }
 0x4d7   :  { %1625 = vmatpush3.msra.mxu0 %v1933_v1  ;;  %1636 = vmatpush3.msra.mxu1 %v1938_v3 }
 0x4d8   :  { %1626 = vmatprep.subr.mxu0 %v1886_v0  ;;  %1637 = vmatprep.subr.mxu1 %v1886_v0 }
 0x4d9   :  { %1627 = vmatpush3.msra.mxu0 %v1935_v2  ;;  %1638 = vmatpush3.msra.mxu1 %v1940_v4 }
 0x4da   :  { %1628 = vmatprep.subr.mxu0 %v1886_v0  ;;  %1639 = vmatprep.subr.mxu1 %v1886_v0 }
 0x4db   :  { %1629 = vmatpush3.msra.mxu0 %v1943_v5  ;;  %1640 = vmatpush3.msra.mxu1 %v1948_v6 }
 0x4dc   :  { %1630 = vmatprep.subr.mxu0 %v1886_v0  ;;  %1641 = vmatprep.subr.mxu1 %v1886_v0 }
 0x4dd   :  { %1631 = vmatpush3.msra.mxu0 %v1951_v7  ;;  %1632 = vmatprep.mubr.msk.f32.mxu0 %vm1887_vm0, %v1886_v0 }
 0x4de   :  { %1642 = vmatpush3.msra.mxu1 %v1956_v8  ;;  %1643 = vmatprep.mubr.msk.f32.mxu1 %vm1887_vm0, %v1886_v0 }
 0x4df   :  { %1646 = vmatprep.subr.mxu0 %v1886_v0  ;;  %1657 = vmatprep.subr.mxu1 %v1886_v0 }
 0x596   :  { %v486_v53 = vpop.f32.mrf.mxu0  ;;  %v563_v54 = vpop.f32.mrf.mxu1 }
 0x597   :  { %v490_v55 = vadd.f32 %v486_v53, %v61_v52  ;;  %v564_v61 = vadd.f32 %v1990_v18, %v563_v54 }
 0x598   :  { %v1612_v56 = vpop.f32.mrf.mxu0  ;;  %v1623_v57 = vpop.f32.mrf.mxu1 }
 0x599   :  { %v1461_v58 = vmul.f32 -1.442695, %v490_v55 }
 0x59b   :  { %1757 = vpow2.f32 %v1461_v58 }
 0x5a8   :  { %v1758_v59 = vpop.eup %1757 }
 0x5a9   :  { %v494_v60 = vadd.f32 1.0, %v1758_v59 }
 0x5ab   :  { %1759 = vrcp.f32 %v494_v60 }
 0x5b8   :  { %v1760_v62 = vpop.eup %1759 }
 0x5b9   :  { %v567_v63 = vmul.f32 %v1760_v62, %v564_v61  ;;  %v574_v12 = vsub.f32 1.0, %v1760_v62  ;;  %v580_v14 = vmul.f32 %v1760_v62, %v414_v50  ;;  %v64_v61 = vld [vmem:[#allocation2 + $0x14] sm:$0xf] }
 0x5bb   :  { %569 = vrot.lane.b32.xlu0 %v567_v63, %s1883_s25 }
 0x62d   :  { %v570_v9 = vpop.permute.xlu0 %569 }
 0x62e   :  { %v572_v10 = vadd.f32 %v570_v9, %v61_v52 }
 0x630   :  { %1761 = vtanh.f32 %v572_v10 }
 0x63d   :  { %v1762_v11 = vpop.eup %1761 }
 0x63e   :  { %576 = vrot.lane.b32.xlu1 %v1762_v11, %s1888_s7 }
 0x6b0   :  { %v577_v13 = vpop.permute.xlu1 %576 }
 0x6b1   :  { %v579_v15 = vmul.f32 %v577_v13, %v574_v12 }
 0x6b3   :  { %v581_v16 = vadd.f32 %v580_v14, %v579_v15 }
 0x6b5   :  { %583 = vrot.lane.b32.xlu0 %v581_v16, %s1888_s7 }
 0x727   :  { %v584_v17 = vpop.permute.xlu0 %583 }
 0x728   :  { %1431 = vst.msk [vmem:[#allocation8 + $0x8] sm:$0xf] %vm1428_vm1, %v584_v17  ;;  %1633 = vmatmul.mubr.msk.f32.vlgmr.msra.gmra.mxu0 %vm76_vm2, %v584_v17  ;;  %1644 = vmatmul.mubr.msk.f32.vlgmr.msra.gmra.mxu1 %vm76_vm2, %v584_v17 }
 0x729   :  { %1647 = vmatpush3.msra.mxu0 %v1933_v1  ;;  %1658 = vmatpush3.msra.mxu1 %v1938_v3 }
 0x72a   :  { %1648 = vmatprep.subr.mxu0 %v1886_v0  ;;  %1659 = vmatprep.subr.mxu1 %v1886_v0 }
 0x72b   :  { %1649 = vmatpush3.msra.mxu0 %v1935_v2  ;;  %1660 = vmatpush3.msra.mxu1 %v1940_v4 }
 0x72c   :  { %1650 = vmatprep.subr.mxu0 %v1886_v0  ;;  %1661 = vmatprep.subr.mxu1 %v1886_v0 }
 0x72d   :  { %1651 = vmatpush3.msra.mxu0 %v1943_v5  ;;  %1662 = vmatpush3.msra.mxu1 %v1948_v6 }
 0x72e   :  { %1652 = vmatprep.subr.mxu0 %v1886_v0  ;;  %1663 = vmatprep.subr.mxu1 %v1886_v0 }
 0x72f   :  { %1653 = vmatpush3.msra.mxu0 %v1951_v7  ;;  %1654 = vmatprep.mubr.msk.f32.mxu0 %vm1887_vm0, %v1886_v0 }
 0x730   :  { %1664 = vmatpush3.msra.mxu1 %v1956_v8  ;;  %1665 = vmatprep.mubr.msk.f32.mxu1 %vm1887_vm0, %v1886_v0 }
 0x731   :  { %1668 = vmatprep.subr.mxu0 %v1886_v0  ;;  %1679 = vmatprep.subr.mxu1 %v1886_v0 }
 0x7e8   :  { %v653_v20 = vpop.f32.mrf.mxu0  ;;  %v730_v21 = vpop.f32.mrf.mxu1 }
 0x7e9   :  { %v657_v22 = vadd.f32 %v653_v20, %v62_v19  ;;  %v731_v28 = vadd.f32 %v1990_v18, %v730_v21 }
 0x7ea   :  { %v1634_v23 = vpop.f32.mrf.mxu0  ;;  %v1645_v24 = vpop.f32.mrf.mxu1 }
 0x7eb   :  { %v1464_v25 = vmul.f32 -1.442695, %v657_v22 }
 0x7ed   :  { %1763 = vpow2.f32 %v1464_v25 }
 0x7fa   :  { %v1764_v26 = vpop.eup %1763 }
 0x7fb   :  { %v661_v27 = vadd.f32 1.0, %v1764_v26 }
 0x7fd   :  { %1765 = vrcp.f32 %v661_v27 }
 0x80a   :  { %v1766_v29 = vpop.eup %1765 }
 0x80b   :  { %v734_v30 = vmul.f32 %v1766_v29, %v731_v28  ;;  %v741_v34 = vsub.f32 1.0, %v1766_v29  ;;  %v747_v36 = vmul.f32 %v1766_v29, %v581_v16 }
 0x80d   :  { %736 = vrot.lane.b32.xlu1 %v734_v30, %s1883_s25 }
 0x87f   :  { %v737_v31 = vpop.permute.xlu1 %736 }
 0x880   :  { %v739_v32 = vadd.f32 %v737_v31, %v62_v19 }
 0x882   :  { %1767 = vtanh.f32 %v739_v32 }
 0x88f   :  { %v1768_v33 = vpop.eup %1767 }
 0x890   :  { %743 = vrot.lane.b32.xlu0 %v1768_v33, %s1888_s7 }
 0x902   :  { %v744_v35 = vpop.permute.xlu0 %743 }
 0x903   :  { %v746_v37 = vmul.f32 %v744_v35, %v741_v34 }
 0x905   :  { %v748_v38 = vadd.f32 %v747_v36, %v746_v37 }
 0x907   :  { %750 = vrot.lane.b32.xlu1 %v748_v38, %s1888_s7 }
 0x979   :  { %v751_v39 = vpop.permute.xlu1 %750 }
 0x97a   :  { %1432 = vst.msk [vmem:[#allocation8 + $0xc] sm:$0xf] %vm1428_vm1, %v751_v39  ;;  %1655 = vmatmul.mubr.msk.f32.vlgmr.msra.gmra.mxu0 %vm76_vm2, %v751_v39  ;;  %1666 = vmatmul.mubr.msk.f32.vlgmr.msra.gmra.mxu1 %vm76_vm2, %v751_v39 }
 0x97b   :  { %1669 = vmatpush3.msra.mxu0 %v1933_v1  ;;  %1680 = vmatpush3.msra.mxu1 %v1938_v3 }
 0x97c   :  { %1670 = vmatprep.subr.mxu0 %v1886_v0  ;;  %1681 = vmatprep.subr.mxu1 %v1886_v0 }
 0x97d   :  { %1671 = vmatpush3.msra.mxu0 %v1935_v2  ;;  %1682 = vmatpush3.msra.mxu1 %v1940_v4 }
 0x97e   :  { %1672 = vmatprep.subr.mxu0 %v1886_v0  ;;  %1683 = vmatprep.subr.mxu1 %v1886_v0 }
 0x97f   :  { %1673 = vmatpush3.msra.mxu0 %v1943_v5  ;;  %1684 = vmatpush3.msra.mxu1 %v1948_v6 }
 0x980   :  { %1674 = vmatprep.subr.mxu0 %v1886_v0  ;;  %1685 = vmatprep.subr.mxu1 %v1886_v0 }
 0x981   :  { %1675 = vmatpush3.msra.mxu0 %v1951_v7  ;;  %1676 = vmatprep.mubr.msk.f32.mxu0 %vm1887_vm0, %v1886_v0 }
 0x982   :  { %1686 = vmatpush3.msra.mxu1 %v1956_v8  ;;  %1687 = vmatprep.mubr.msk.f32.mxu1 %vm1887_vm0, %v1886_v0 }
 0x983   :  { %1690 = vmatprep.subr.mxu0 %v1886_v0  ;;  %1701 = vmatprep.subr.mxu1 %v1886_v0 }
 0xa3a   :  { %v820_v41 = vpop.f32.mrf.mxu0  ;;  %v897_v42 = vpop.f32.mrf.mxu1 }
 0xa3b   :  { %v824_v43 = vadd.f32 %v820_v41, %v63_v40  ;;  %v898_v49 = vadd.f32 %v1990_v18, %v897_v42 }
 0xa3c   :  { %v1656_v44 = vpop.f32.mrf.mxu0  ;;  %v1667_v45 = vpop.f32.mrf.mxu1 }
 0xa3d   :  { %v1467_v46 = vmul.f32 -1.442695, %v824_v43 }
 0xa3f   :  { %1769 = vpow2.f32 %v1467_v46 }
 0xa4c   :  { %v1770_v47 = vpop.eup %1769 }
 0xa4d   :  { %v828_v48 = vadd.f32 1.0, %v1770_v47 }
 0xa4f   :  { %1771 = vrcp.f32 %v828_v48 }
 0xa5c   :  { %v1772_v50 = vpop.eup %1771 }
 0xa5d   :  { %v901_v51 = vmul.f32 %v1772_v50, %v898_v49  ;;  %v908_v55 = vsub.f32 1.0, %v1772_v50  ;;  %v914_v57 = vmul.f32 %v1772_v50, %v748_v38 }
 0xa5f   :  { %903 = vrot.lane.b32.xlu0 %v901_v51, %s1883_s25 }
 0xad1   :  { %v904_v52 = vpop.permute.xlu0 %903 }
 0xad2   :  { %v906_v53 = vadd.f32 %v904_v52, %v63_v40  ;;  %v66_v40 = vld [vmem:[#allocation2 + $0x1c] sm:$0xf] }
 0xad4   :  { %1773 = vtanh.f32 %v906_v53 }
 0xae1   :  { %v1774_v54 = vpop.eup %1773 }
 0xae2   :  { %910 = vrot.lane.b32.xlu1 %v1774_v54, %s1888_s7 }
 0xb54   :  { %v911_v56 = vpop.permute.xlu1 %910 }
 0xb55   :  { %v913_v58 = vmul.f32 %v911_v56, %v908_v55 }
 0xb57   :  { %v915_v59 = vadd.f32 %v914_v57, %v913_v58 }
 0xb59   :  { %917 = vrot.lane.b32.xlu0 %v915_v59, %s1888_s7 }
 0xbcb   :  { %v918_v60 = vpop.permute.xlu0 %917 }
 0xbcc   :  { %1433 = vst.msk [vmem:[#allocation8 + $0x10] sm:$0xf] %vm1428_vm1, %v918_v60  ;;  %1677 = vmatmul.mubr.msk.f32.vlgmr.msra.gmra.mxu0 %vm76_vm2, %v918_v60  ;;  %1688 = vmatmul.mubr.msk.f32.vlgmr.msra.gmra.mxu1 %vm76_vm2, %v918_v60 }
 0xbcd   :  { %1691 = vmatpush3.msra.mxu0 %v1933_v1  ;;  %1702 = vmatpush3.msra.mxu1 %v1938_v3 }
 0xbce   :  { %1692 = vmatprep.subr.mxu0 %v1886_v0  ;;  %1703 = vmatprep.subr.mxu1 %v1886_v0 }
 0xbcf   :  { %1693 = vmatpush3.msra.mxu0 %v1935_v2  ;;  %1704 = vmatpush3.msra.mxu1 %v1940_v4 }
 0xbd0   :  { %1694 = vmatprep.subr.mxu0 %v1886_v0  ;;  %1705 = vmatprep.subr.mxu1 %v1886_v0 }
 0xbd1   :  { %1695 = vmatpush3.msra.mxu0 %v1943_v5  ;;  %1706 = vmatpush3.msra.mxu1 %v1948_v6 }
 0xbd2   :  { %1696 = vmatprep.subr.mxu0 %v1886_v0  ;;  %1707 = vmatprep.subr.mxu1 %v1886_v0 }
 0xbd3   :  { %1697 = vmatpush3.msra.mxu0 %v1951_v7  ;;  %1698 = vmatprep.mubr.msk.f32.mxu0 %vm1887_vm0, %v1886_v0 }
 0xbd4   :  { %1708 = vmatpush3.msra.mxu1 %v1956_v8  ;;  %1709 = vmatprep.mubr.msk.f32.mxu1 %vm1887_vm0, %v1886_v0 }
 0xbd5   :  { %1712 = vmatprep.subr.mxu0 %v1886_v0  ;;  %1723 = vmatprep.subr.mxu1 %v1886_v0 }
 0xc8c   :  { %v987_v62 = vpop.f32.mrf.mxu0  ;;  %v1064_v63 = vpop.f32.mrf.mxu1 }
 0xc8d   :  { %v991_v9 = vadd.f32 %v987_v62, %v64_v61  ;;  %v1065_v15 = vadd.f32 %v1990_v18, %v1064_v63 }
 0xc8e   :  { %v1678_v10 = vpop.f32.mrf.mxu0  ;;  %v1689_v11 = vpop.f32.mrf.mxu1 }
 0xc8f   :  { %v1470_v12 = vmul.f32 -1.442695, %v991_v9 }
 0xc91   :  { %1775 = vpow2.f32 %v1470_v12 }
 0xc9e   :  { %v1776_v13 = vpop.eup %1775 }
 0xc9f   :  { %v995_v14 = vadd.f32 1.0, %v1776_v13 }
 0xca1   :  { %1777 = vrcp.f32 %v995_v14 }
 0xcae   :  { %v1778_v16 = vpop.eup %1777 }
 0xcaf   :  { %v1068_v17 = vmul.f32 %v1778_v16, %v1065_v15  ;;  %v1075_v22 = vsub.f32 1.0, %v1778_v16  ;;  %v1081_v24 = vmul.f32 %v1778_v16, %v915_v59 }
 0xcb1   :  { %1070 = vrot.lane.b32.xlu1 %v1068_v17, %s1883_s25 }
 0xd23   :  { %v1071_v19 = vpop.permute.xlu1 %1070 }
 0xd24   :  { %v1073_v20 = vadd.f32 %v1071_v19, %v64_v61 }
 0xd26   :  { %1779 = vtanh.f32 %v1073_v20 }
 0xd33   :  { %v1780_v21 = vpop.eup %1779 }
 0xd34   :  { %1077 = vrot.lane.b32.xlu0 %v1780_v21, %s1888_s7 }
 0xda6   :  { %v1078_v23 = vpop.permute.xlu0 %1077 }
 0xda7   :  { %v1080_v25 = vmul.f32 %v1078_v23, %v1075_v22 }
 0xda9   :  { %v1082_v26 = vadd.f32 %v1081_v24, %v1080_v25 }
 0xdab   :  { %1084 = vrot.lane.b32.xlu1 %v1082_v26, %s1888_s7 }
 0xe1d   :  { %v1085_v27 = vpop.permute.xlu1 %1084 }
 0xe1e   :  { %1434 = vst.msk [vmem:[#allocation8 + $0x14] sm:$0xf] %vm1428_vm1, %v1085_v27  ;;  %1699 = vmatmul.mubr.msk.f32.vlgmr.msra.gmra.mxu0 %vm76_vm2, %v1085_v27  ;;  %1710 = vmatmul.mubr.msk.f32.vlgmr.msra.gmra.mxu1 %vm76_vm2, %v1085_v27 }
 0xe1f   :  { %1713 = vmatpush3.msra.mxu0 %v1933_v1  ;;  %1724 = vmatpush3.msra.mxu1 %v1938_v3  ;;  %v65_v1 = vld [vmem:[#allocation2 + $0x18] sm:$0xf] }
 0xe20   :  { %1714 = vmatprep.subr.mxu0 %v1886_v0  ;;  %1725 = vmatprep.subr.mxu1 %v1886_v0 }
 0xe21   :  { %1715 = vmatpush3.msra.mxu0 %v1935_v2  ;;  %1726 = vmatpush3.msra.mxu1 %v1940_v4 }
 0xe22   :  { %1716 = vmatprep.subr.mxu0 %v1886_v0  ;;  %1727 = vmatprep.subr.mxu1 %v1886_v0 }
 0xe23   :  { %1717 = vmatpush3.msra.mxu0 %v1943_v5  ;;  %1728 = vmatpush3.msra.mxu1 %v1948_v6 }
 0xe24   :  { %1718 = vmatprep.subr.mxu0 %v1886_v0  ;;  %1729 = vmatprep.subr.mxu1 %v1886_v0 }
 0xe25   :  { %1719 = vmatpush3.msra.mxu0 %v1951_v7  ;;  %1720 = vmatprep.mubr.msk.f32.mxu0 %vm1887_vm0, %v1886_v0 }
 0xe26   :  { %1730 = vmatpush3.msra.mxu1 %v1956_v8  ;;  %1731 = vmatprep.mubr.msk.f32.mxu1 %vm1887_vm0, %v1886_v0 }
 0xede   :  { %v1154_v2 = vpop.f32.mrf.mxu0  ;;  %v1231_v3 = vpop.f32.mrf.mxu1 }
 0xedf   :  { %v1158_v4 = vadd.f32 %v1154_v2, %v65_v1  ;;  %v1232_v7 = vadd.f32 %v1990_v18, %v1231_v3 }
 0xee0   :  { %v1700_v5 = vpop.f32.mrf.mxu0  ;;  %v1711_v6 = vpop.f32.mrf.mxu1 }
 0xee1   :  { %v1473_v28 = vmul.f32 -1.442695, %v1158_v4 }
 0xee3   :  { %1781 = vpow2.f32 %v1473_v28 }
 0xef0   :  { %v1782_v29 = vpop.eup %1781 }
 0xef1   :  { %v1162_v30 = vadd.f32 1.0, %v1782_v29 }
 0xef3   :  { %1783 = vrcp.f32 %v1162_v30 }
 0xf00   :  { %v1784_v31 = vpop.eup %1783 }
 0xf01   :  { %v1235_v32 = vmul.f32 %v1784_v31, %v1232_v7  ;;  %v1242_v34 = vsub.f32 1.0, %v1784_v31  ;;  %v1248_v36 = vmul.f32 %v1784_v31, %v1082_v26 }
 0xf03   :  { %1237 = vrot.lane.b32.xlu0 %v1235_v32, %s1883_s25 }
 0xf75   :  { %v1238_v8 = vpop.permute.xlu0 %1237 }
 0xf76   :  { %v1240_v33 = vadd.f32 %v1238_v8, %v65_v1 }
 0xf78   :  { %1785 = vtanh.f32 %v1240_v33 }
 0xf85   :  { %v1786_v0 = vpop.eup %1785 }
 0xf86   :  { %1244 = vrot.lane.b32.xlu1 %v1786_v0, %s1888_s7 }
 0xff8   :  { %v1245_v35 = vpop.permute.xlu1 %1244 }
 0xff9   :  { %v1247_v37 = vmul.f32 %v1245_v35, %v1242_v34 }
 0xffb   :  { %v1249_v38 = vadd.f32 %v1248_v36, %v1247_v37 }
 0xffd   :  { %1251 = vrot.lane.b32.xlu0 %v1249_v38, %s1888_s7 }
0x106f   :  { %v1252_v39 = vpop.permute.xlu0 %1251 }
0x1070   :  { %1435 = vst.msk [vmem:[#allocation8 + $0x18] sm:$0xf] %vm1428_vm1, %v1252_v39  ;;  %1721 = vmatmul.mubr.msk.f32.vlgmr.msra.gmra.mxu0 %vm76_vm2, %v1252_v39  ;;  %1732 = vmatmul.mubr.msk.f32.vlgmr.msra.gmra.mxu1 %vm76_vm2, %v1252_v39 }
0x1130   :  { %v1321_v41 = vpop.f32.mrf.mxu0  ;;  %v1398_v42 = vpop.f32.mrf.mxu1 }
0x1131   :  { %v1325_v43 = vadd.f32 %v1321_v41, %v66_v40  ;;  %v1399_v49 = vadd.f32 %v1990_v18, %v1398_v42 }
0x1132   :  { %v1722_v44 = vpop.f32.mrf.mxu0  ;;  %v1733_v45 = vpop.f32.mrf.mxu1 }
0x1133   :  { %v1476_v46 = vmul.f32 -1.442695, %v1325_v43 }
0x1135   :  { %1787 = vpow2.f32 %v1476_v46 }
0x1142   :  { %v1788_v47 = vpop.eup %1787 }
0x1143   :  { %v1329_v48 = vadd.f32 1.0, %v1788_v47 }
0x1145   :  { %1789 = vrcp.f32 %v1329_v48 }
0x1152   :  { %v1790_v50 = vpop.eup %1789 }
0x1153   :  { %v1402_v51 = vmul.f32 %v1790_v50, %v1399_v49  ;;  %v1409_v55 = vsub.f32 1.0, %v1790_v50  ;;  %v1415_v57 = vmul.f32 %v1790_v50, %v1249_v38 }
0x1155   :  { %1404 = vrot.lane.b32.xlu1 %v1402_v51, %s1883_s25 }
0x11c7   :  { %v1405_v52 = vpop.permute.xlu1 %1404 }
0x11c8   :  { %v1407_v53 = vadd.f32 %v1405_v52, %v66_v40 }
0x11ca   :  { %1791 = vtanh.f32 %v1407_v53 }
0x11d7   :  { %v1792_v54 = vpop.eup %1791 }
0x11d8   :  { %1411 = vrot.lane.b32.xlu0 %v1792_v54, %s1888_s7 }
0x124a   :  { %v1412_v56 = vpop.permute.xlu0 %1411 }
0x124b   :  { %v1414_v58 = vmul.f32 %v1412_v56, %v1409_v55 }
0x124d   :  { %v1416_v59 = vadd.f32 %v1415_v57, %v1414_v58 }
0x124f   :  { %1418 = vrot.lane.b32.xlu1 %v1416_v59, %s1888_s7 }
0x12c1   :  { %v1419_v18 = vpop.permute.xlu1 %1418 }
0x12c2   :  { %1436 = vst.msk [vmem:[#allocation8 + $0x1c] sm:$0xf] %vm1428_vm1, %v1419_v18 }
0x12c3   :  { %1864 = shalt.err (!%p1861_p5)
}
0x12c4   :  { %1448 = dma.vmem_to_hbm [thread:$0]  %s1443_s8, 512, %s2174_s4, [#allocation4], %s1883_s25, %s1883_s25, %s1884_s26  }
0x12c5   :  { %1877 = dma.done.wait [#allocation4], 512  }
0x12c6   :  { %1878 = vsyncadd [#allocation4], 4294966784 }
0x12c7   :  { %1452 = vsyncpa [#allocation3], 1 }
0x12c8   :  { %1453 = vsyncpa [#allocation6], 1 }
0x12c9   :  { %1454 = vsyncpa [#allocation4], 1 }

</bundles_post_ra>
